<compile_context>
chip_gen: v6e
topology: v6e:2x2x1
jax: 0.10.0
libtpu: 0.0.40
codegen_flags: <defaults>
</compile_context>

<pallas_src>
import jax
import jax.numpy as jnp
from jax.experimental import pallas as pl
from jax.experimental.pallas import tpu as pltpu


def _round_up(a, b):
    return (a + b - 1) // b * b


def _cdiv(a, b):
    return -(-a // b)


def _mlp_kernel(h1p_ref, b1_ref, w2_ref, b2_ref, wh_ref, bh_ref, out_ref):
    # First layer's matmul was folded into the precomputed gather tables in
    # the wrapper; here we only add the bias and apply tanh (f32).
    h1 = jnp.tanh(h1p_ref[...] + b1_ref[...])
    # hidden2 = tanh(h1 @ W2 + b2)   (bf16 MXU inputs, f32 accumulate)
    h2 = jnp.tanh(
        jnp.dot(h1.astype(w2_ref.dtype), w2_ref[...],
                preferred_element_type=jnp.float32)
        + b2_ref[...]
    )
    # Fused heads: one lane-dense 128-wide matmul (split into trans/arcs in
    # the wrapper).  Output stored in bf16.
    out = (
        jnp.dot(h2.astype(wh_ref.dtype), wh_ref[...],
                preferred_element_type=jnp.float32)
        + bh_ref[...]
    )
    out_ref[...] = out.astype(out_ref.dtype)


def init_params(key, hidden_units, words_size, pos_size, arc_size, trans_size):
    """Deterministic synthetic parameters (shapes match nn.Module __init__).

    Linear weights are stored (in, out); biases as (1, out)."""
    ks = jax.random.split(key, 12)
    s = 0.05
    return {
        "word_emb": jax.random.normal(ks[0], (words_size, 50), jnp.float32) * s,
        "pos_emb":  jax.random.normal(ks[1], (pos_size, 50), jnp.float32) * s,
        "arc_emb":  jax.random.normal(ks[2], (arc_size, 50), jnp.float32) * s,
        "w1": jax.random.normal(ks[3], (2400, hidden_units), jnp.float32) * s,
        "b1": jax.random.normal(ks[4], (1, hidden_units), jnp.float32) * s,
        "w2": jax.random.normal(ks[5], (hidden_units, 500), jnp.float32) * s,
        "b2": jax.random.normal(ks[6], (1, 500), jnp.float32) * s,
        "wt": jax.random.normal(ks[7], (500, trans_size), jnp.float32) * s,
        "bt": jax.random.normal(ks[8], (1, trans_size), jnp.float32) * s,
        "wa": jax.random.normal(ks[9], (500, arc_size), jnp.float32) * s,
        "ba": jax.random.normal(ks[10], (1, arc_size), jnp.float32) * s,
    }


def _prepare_kernel_params(params):
    """Precompute per-slot embedding@W1 tables and pad/fuse remaining weights."""
    H = params["w1"].shape[1]
    trans_size = params["wt"].shape[1]
    arc_size_out = params["wa"].shape[1]
    words_size = params["word_emb"].shape[0]
    pos_size = params["pos_emb"].shape[0]
    arc_size_in = params["arc_emb"].shape[0]

    H_pad = _round_up(H, 128)
    H2_pad = _round_up(500, 128)                        # 512
    N_pad = _round_up(trans_size + arc_size_out, 128)   # 128 for small heads

    # --- parser precomputation trick: P_s = E_s @ W1[s*50:(s+1)*50, :] ---
    # Word slots 0..17, POS slots 18..35, arc slots 36..47.  Kept in f32 so
    # the first layer stays numerically faithful; the K=2400 matmul never
    # runs at inference time.
    w1 = params["w1"]
    w1_word = w1[:900].reshape(18, 50, H)
    w1_pos = w1[900:1800].reshape(18, 50, H)
    w1_arc = w1[1800:2400].reshape(12, 50, H)
    p_word = jnp.einsum("vd,sdh->svh", params["word_emb"], w1_word)
    p_pos = jnp.einsum("vd,sdh->svh", params["pos_emb"], w1_pos)
    p_arc = jnp.einsum("vd,sdh->svh", params["arc_emb"], w1_arc)
    p_stacked = jnp.concatenate(
        [p_word.reshape(18 * words_size, H),
         p_pos.reshape(18 * pos_size, H),
         p_arc.reshape(12 * arc_size_in, H)], axis=0)
    p_stacked = jnp.pad(p_stacked, ((0, 0), (0, H_pad - H)))  # (R, H_pad) f32

    # Per-slot row offsets into the stacked table.
    word_off = jnp.arange(18, dtype=jnp.int32) * words_size
    pos_off = 18 * words_size + jnp.arange(18, dtype=jnp.int32) * pos_size
    arc_off = (18 * words_size + 18 * pos_size
               + jnp.arange(12, dtype=jnp.int32) * arc_size_in)
    offsets = jnp.concatenate([word_off, pos_off, arc_off])   # (48,)

    # --- remaining MLP weights: bf16, 128-aligned, zero-padded (exact) ---
    b1 = jnp.zeros((1, H_pad), jnp.float32).at[:, :H].set(params["b1"])
    w2 = jnp.zeros((H_pad, H2_pad), jnp.bfloat16).at[:H, :500].set(
        params["w2"].astype(jnp.bfloat16))
    b2 = jnp.zeros((1, H2_pad), jnp.float32).at[:, :500].set(params["b2"])
    wh = (jnp.zeros((H2_pad, N_pad), jnp.bfloat16)
          .at[:500, :trans_size].set(params["wt"].astype(jnp.bfloat16))
          .at[:500, trans_size:trans_size + arc_size_out].set(
              params["wa"].astype(jnp.bfloat16)))
    bh = (jnp.zeros((1, N_pad), jnp.float32)
          .at[:, :trans_size].set(params["bt"])
          .at[:, trans_size:trans_size + arc_size_out].set(params["ba"]))

    kp = dict(p_stacked=p_stacked, offsets=offsets,
              b1=b1, w2=w2, b2=b2, wh=wh, bh=bh)
    dims = dict(H_pad=H_pad, H2_pad=H2_pad, N_pad=N_pad,
                trans_size=trans_size, arc_size=arc_size_out)
    return kp, dims


def arc_eager_parser_forward(x, params, *, tile_m=1024):
    """Forward pass. x: (B, 48) int32 indices -> (out_trans, out_arcs)."""
    B = x.shape[0]
    kp, d = _prepare_kernel_params(params)
    H_pad, H2_pad, N_pad = d["H_pad"], d["H2_pad"], d["N_pad"]
    trans_size, arc_size = d["trans_size"], d["arc_size"]

    # --- glue: 48 gathered 128-wide rows of the precomputed tables, summed
    # into the first layer's pre-activation (B, H_pad) f32.  This replaces the
    # old (B, 2400) embedding round trip (~19x less activation HBM traffic and
    # ~78% fewer FLOPs).  Note jnp.take clamps out-of-range indices under jit.
    # TODO(synk): a fully in-kernel gather (scalar-prefetched indices + DMA /
    # dynamic gather on a VMEM-resident P table) would remove even this tiny
    # (B, 128) round trip.
    flat_idx = x.astype(jnp.int32) + kp["offsets"][None, :]            # (B, 48)
    h1_pre = jnp.take(kp["p_stacked"], flat_idx, axis=0).sum(axis=1)   # (B, H_pad)

    # --- batch tiling: balanced tiles, multiple of 16 rows (bf16 sublane
    # packing), and >=2 grid steps when the batch allows it so that the
    # "parallel" axis can shard across both v7x TensorCores.
    min_tiles = 2 if B >= 32 else 1
    n_tiles = max(min_tiles, _cdiv(B, tile_m))
    TM = _round_up(_cdiv(B, n_tiles), 16)
    n_tiles = _cdiv(B, TM)
    B_pad = n_tiles * TM
    h1_pre_p = jnp.pad(h1_pre, ((0, B_pad - B), (0, 0)))

    flops = 2 * B_pad * (H_pad * H2_pad + H2_pad * N_pad)
    transcendentals = B_pad * (H_pad + H2_pad)
    bytes_accessed = (B_pad * H_pad * 4 + B_pad * N_pad * 2
                      + 2 * (H_pad * H2_pad + H2_pad * N_pad)
                      + 4 * (H_pad + H2_pad + N_pad))

    out = pl.pallas_call(
        _mlp_kernel,
        out_shape=jax.ShapeDtypeStruct((B_pad, N_pad), jnp.bfloat16),
        grid=(n_tiles,),
        in_specs=[
            pl.BlockSpec((TM, H_pad), lambda i: (i, 0)),       # h1 pre-act tile
            pl.BlockSpec((1, H_pad), lambda i: (0, 0)),        # b1 (resident)
            pl.BlockSpec((H_pad, H2_pad), lambda i: (0, 0)),   # W2 (resident)
            pl.BlockSpec((1, H2_pad), lambda i: (0, 0)),       # b2
            pl.BlockSpec((H2_pad, N_pad), lambda i: (0, 0)),   # fused head W
            pl.BlockSpec((1, N_pad), lambda i: (0, 0)),        # fused head b
        ],
        out_specs=pl.BlockSpec((TM, N_pad), lambda i: (i, 0)),
        compiler_params=pltpu.CompilerParams(
            dimension_semantics=("parallel",)),
        cost_estimate=pl.CostEstimate(
            flops=flops, transcendentals=transcendentals,
            bytes_accessed=bytes_accessed),
    )(h1_pre_p, kp["b1"], kp["w2"], kp["b2"], kp["wh"], kp["bh"])

    out = out.astype(jnp.float32)
    out_trans = out[:B, :trans_size]
    out_arcs = out[:B, trans_size:trans_size + arc_size]
    return out_trans, out_arcs


def _reference_forward(x, params):
    """Pure-JAX reference: f32 first layer (matches the f32 precompute path),
    bf16-rounded W2/head weights (matching what the kernel is given)."""
    B = x.shape[0]
    bf = lambda a: a.astype(jnp.bfloat16).astype(jnp.float32)
    word_e = jnp.take(params["word_emb"], x[:, :18], axis=0).reshape(B, 900)
    pos_e = jnp.take(params["pos_emb"], x[:, 18:36], axis=0).reshape(B, 900)
    arc_e = jnp.take(params["arc_emb"], x[:, 36:48], axis=0).reshape(B, 600)
    emb = jnp.concatenate([word_e, pos_e, arc_e], axis=1)
    h1 = jnp.tanh(emb @ params["w1"] + params["b1"])
    h2 = jnp.tanh(h1 @ bf(params["w2"]) + params["b2"])
    return (h2 @ bf(params["wt"]) + params["bt"],
            h2 @ bf(params["wa"]) + params["ba"])


if __name__ == "__main__":
    # Small deterministic config.
    hidden_units = 128
    words_size = 100
    pos_size = 32
    arc_size = 16
    trans_size = 8
    B = 4

    key = jax.random.PRNGKey(0)
    pkey, xkey = jax.random.split(key)
    params = init_params(pkey, hidden_units, words_size, pos_size,
                         arc_size, trans_size)

    # Index input: each segment valid for its vocab size.
    k1, k2, k3 = jax.random.split(xkey, 3)
    word_idx = jax.random.randint(k1, (B, 18), 0, words_size, jnp.int32)
    pos_idx = jax.random.randint(k2, (B, 18), 0, pos_size, jnp.int32)
    arc_idx = jax.random.randint(k3, (B, 12), 0, arc_size, jnp.int32)
    x = jnp.concatenate([word_idx, pos_idx, arc_idx], axis=1)  # (B, 48) int32

    out_trans, out_arcs = arc_eager_parser_forward(x, params)
    jax.block_until_ready((out_trans, out_arcs))

    # Correctness check (kernel with bf16 W2/head weights, bf16 in-kernel
    # activation casts and bf16 output store vs. f32-math reference on the
    # same bf16-rounded weights).
    ref_trans, ref_arcs = _reference_forward(x, params)
    assert out_trans.shape == (B, trans_size)
    assert out_arcs.shape == (B, arc_size)
    assert jnp.allclose(out_trans, ref_trans, atol=1e-2, rtol=2e-2), (
        float(jnp.max(jnp.abs(out_trans - ref_trans))))
    assert jnp.allclose(out_arcs, ref_arcs, atol=1e-2, rtol=2e-2), (
        float(jnp.max(jnp.abs(out_arcs - ref_arcs))))

    print("KERNEL_OK")
</pallas_src>

<mosaic_0001>
module attributes {stable_mosaic.version = 11 : i64} {
  func.func @_mlp_kernel(%arg0: i32, %arg1: memref<16x128xf32, #tpu.memory_space<vmem>>, %arg2: memref<1x128xf32, #tpu.memory_space<vmem>>, %arg3: memref<128x512xbf16, #tpu.memory_space<vmem>>, %arg4: memref<1x512xf32, #tpu.memory_space<vmem>>, %arg5: memref<512x128xbf16, #tpu.memory_space<vmem>>, %arg6: memref<1x128xf32, #tpu.memory_space<vmem>>, %arg7: memref<16x128xbf16, #tpu.memory_space<vmem>>) attributes {dimension_semantics = [#tpu.dimension_semantics<parallel>], iteration_bounds = array<i64: 1>, scalar_prefetch = 0 : i64, scratch_operands = 0 : i64, tpu.core_type = #tpu.core_type<tc>, window_params = [{transform_indices = @transform_0, window_bounds = array<i64: 16, 128>}, {pipeline_mode = #tpu.pipeline_mode<synchronous>, transform_indices = @transform_1, window_bounds = array<i64: 1, 128>}, {pipeline_mode = #tpu.pipeline_mode<synchronous>, transform_indices = @transform_2, window_bounds = array<i64: 128, 512>}, {pipeline_mode = #tpu.pipeline_mode<synchronous>, transform_indices = @transform_3, window_bounds = array<i64: 1, 512>}, {pipeline_mode = #tpu.pipeline_mode<synchronous>, transform_indices = @transform_4, window_bounds = array<i64: 512, 128>}, {pipeline_mode = #tpu.pipeline_mode<synchronous>, transform_indices = @transform_5, window_bounds = array<i64: 1, 128>}, {transform_indices = @transform_6, window_bounds = array<i64: 16, 128>}]} {
    %c0 = arith.constant 0 : index
    %c0_0 = arith.constant 0 : index
    %0 = vector.load %arg1[%c0, %c0_0] : memref<16x128xf32, #tpu.memory_space<vmem>>, vector<16x128xf32>
    %c0_1 = arith.constant 0 : index
    %c0_2 = arith.constant 0 : index
    %1 = vector.load %arg2[%c0_1, %c0_2] : memref<1x128xf32, #tpu.memory_space<vmem>>, vector<1x128xf32>
    %2 = vector.broadcast %1 : vector<1x128xf32> to vector<16x128xf32>
    %3 = arith.addf %0, %2 : vector<16x128xf32>
    %4 = math.tanh %3 : vector<16x128xf32>
    %5 = arith.truncf %4 : vector<16x128xf32> to vector<16x128xbf16>
    %c0_3 = arith.constant 0 : index
    %c0_4 = arith.constant 0 : index
    %6 = vector.load %arg3[%c0_3, %c0_4] : memref<128x512xbf16, #tpu.memory_space<vmem>>, vector<128x512xbf16>
    %cst = arith.constant dense<0.000000e+00> : vector<16x512xf32>
    %7 = tpu.matmul %5, %6, %cst {dimension_numbers = #tpu.dot_dimension_numbers<[1], [0], [0], [1], [0, 0, 1, 1], [], []>} : vector<16x128xbf16>, vector<128x512xbf16>, vector<16x512xf32> -> vector<16x512xf32>
    %c0_5 = arith.constant 0 : index
    %c0_6 = arith.constant 0 : index
    %8 = vector.load %arg4[%c0_5, %c0_6] : memref<1x512xf32, #tpu.memory_space<vmem>>, vector<1x512xf32>
    %9 = vector.broadcast %8 : vector<1x512xf32> to vector<16x512xf32>
    %10 = arith.addf %7, %9 : vector<16x512xf32>
    %11 = math.tanh %10 : vector<16x512xf32>
    %12 = arith.truncf %11 : vector<16x512xf32> to vector<16x512xbf16>
    %c0_7 = arith.constant 0 : index
    %c0_8 = arith.constant 0 : index
    %13 = vector.load %arg5[%c0_7, %c0_8] : memref<512x128xbf16, #tpu.memory_space<vmem>>, vector<512x128xbf16>
    %cst_9 = arith.constant dense<0.000000e+00> : vector<16x128xf32>
    %14 = tpu.matmul %12, %13, %cst_9 {dimension_numbers = #tpu.dot_dimension_numbers<[1], [0], [0], [1], [0, 0, 1, 1], [], []>} : vector<16x512xbf16>, vector<512x128xbf16>, vector<16x128xf32> -> vector<16x128xf32>
    %c0_10 = arith.constant 0 : index
    %c0_11 = arith.constant 0 : index
    %15 = vector.load %arg6[%c0_10, %c0_11] : memref<1x128xf32, #tpu.memory_space<vmem>>, vector<1x128xf32>
    %16 = vector.broadcast %15 : vector<1x128xf32> to vector<16x128xf32>
    %17 = arith.addf %14, %16 : vector<16x128xf32>
    %18 = arith.truncf %17 : vector<16x128xf32> to vector<16x128xbf16>
    %c0_12 = arith.constant 0 : index
    %c0_13 = arith.constant 0 : index
    %19 = vector.load %arg7[%c0_12, %c0_13] : memref<16x128xbf16, #tpu.memory_space<vmem>>, vector<16x128xbf16>
    tpu.vector_store %arg7[%c0_12, %c0_13], %18 {strides = array<i32>} : memref<16x128xbf16, #tpu.memory_space<vmem>>, vector<16x128xbf16>,
    return
  }
  func.func @transform_0(%arg0: i32) -> (i32, i32) {
    %c0_i32 = arith.constant 0 : i32
    %c0_i32_0 = arith.constant 0 : i32
    return %arg0, %c0_i32 : i32, i32
  }
  func.func @transform_1(%arg0: i32) -> (i32, i32) {
    %c0_i32 = arith.constant 0 : i32
    %c0_i32_0 = arith.constant 0 : i32
    %c0_i32_1 = arith.constant 0 : i32
    return %c0_i32, %c0_i32_0 : i32, i32
  }
  func.func @transform_2(%arg0: i32) -> (i32, i32) {
    %c0_i32 = arith.constant 0 : i32
    %c0_i32_0 = arith.constant 0 : i32
    %c0_i32_1 = arith.constant 0 : i32
    return %c0_i32, %c0_i32_0 : i32, i32
  }
  func.func @transform_3(%arg0: i32) -> (i32, i32) {
    %c0_i32 = arith.constant 0 : i32
    %c0_i32_0 = arith.constant 0 : i32
    %c0_i32_1 = arith.constant 0 : i32
    return %c0_i32, %c0_i32_0 : i32, i32
  }
  func.func @transform_4(%arg0: i32) -> (i32, i32) {
    %c0_i32 = arith.constant 0 : i32
    %c0_i32_0 = arith.constant 0 : i32
    %c0_i32_1 = arith.constant 0 : i32
    return %c0_i32, %c0_i32_0 : i32, i32
  }
  func.func @transform_5(%arg0: i32) -> (i32, i32) {
    %c0_i32 = arith.constant 0 : i32
    %c0_i32_0 = arith.constant 0 : i32
    %c0_i32_1 = arith.constant 0 : i32
    return %c0_i32, %c0_i32_0 : i32, i32
  }
  func.func @transform_6(%arg0: i32) -> (i32, i32) {
    %c0_i32 = arith.constant 0 : i32
    %c0_i32_0 = arith.constant 0 : i32
    return %arg0, %c0_i32 : i32, i32
  }
}

</mosaic_0001>

<bundles_post_ra>
// kernel: tpu_custom_call.1
= control target key start
LH: loop header
LB: loop body
LE: loop exit
PB: predicated region body
PF: predicated region fallthrough
CT: control target
= control target key end

     0   :  { %11 = vsyncpa [#allocation3], 0  ;;  %s1154_s0 = inlined_call_operand.hbm [shape: f32[16,128], index: 0, kind: input, shape index: {}]   ;;  %s1155_s1 = inlined_call_operand.vmem [shape: f32[1,128], index: 1, kind: input, shape index: {}]   ;;  %s1156_s2 = inlined_call_operand.hbm [shape: bf16[128,512], index: 2, kind: input, shape index: {}]   ;;  %s1157_s3 = inlined_call_operand.vmem [shape: f32[1,512], index: 3, kind: input, shape index: {}]   ;;  %s1158_s4 = inlined_call_operand.hbm [shape: bf16[512,128], index: 4, kind: input, shape index: {}]   ;;  %s1159_s5 = inlined_call_operand.vmem [shape: f32[1,128], index: 5, kind: input, shape index: {}]   ;;  %s1160_s6 = inlined_call_operand.hbm [shape: bf16[16,128], index: 6, kind: output, shape index: {}]  }
   0x1   :  { %12 = vsyncpa [#allocation6], 0 }
   0x2   :  { %13 = vsyncpa [#allocation4], 0  ;;  %s1081_s21 = smov [#allocation5]  }
   0x3   :  { %s33_s22 = sshll.u32 %s1081_s21, 4  ;;  %s34_s22 = int_to_ptr.vmem [resolvable:$true] %s33_s22 }
   0x4   :  { %s1003_s23 = scalar_lea.vmem %s34_s22, 4096  ;;  %p1008_p1 = scmp.lt.s32.totalorder %s34_s22, %s34_s22 }
   0x5   :  { %p1004_p0 = scmp.ne.s32.totalorder %s34_s22, %s1003_s23  ;;  %p1009_p2 = scmp.lt.s32.totalorder %s1003_s23, %s1003_s23 }
   0x7   :  { %p1010_p3 = por %p1009_p2, %p1008_p1 }
   0x9   :  { %p1011_p4 = pnand %p1010_p3, %p1004_p0 }
   0xb   :  { %1014 = shalt.err (!%p1011_p4)
}
   0xc   :  { %s1082_s24 = smov 256   ;;  %s1083_s25 = smov 16  }
   0xd   :  { %39 = dma.hbm_to_vmem [thread:$0]  %s1156_s2, 4096, %s34_s22, [#allocation6], %s1082_s24, %s1082_s24, %s1083_s25  }
   0xe   :  { %s1084_s28 = smov [#allocation2]  }
   0xf   :  { %s19_s29 = sshll.u32 %s1084_s28, 4  ;;  %s20_s29 = int_to_ptr.vmem [resolvable:$true] %s19_s29 }
  0x10   :  { %s1023_s30 = scalar_lea.vmem %s20_s29, 256  ;;  %p1028_p6 = scmp.lt.s32.totalorder %s20_s29, %s20_s29 }
  0x11   :  { %p1024_p5 = scmp.ne.s32.totalorder %s20_s29, %s1023_s30  ;;  %p1029_p7 = scmp.lt.s32.totalorder %s1023_s30, %s1023_s30 }
  0x13   :  { %p1030_p8 = por %p1029_p7, %p1028_p6 }
  0x15   :  { %p1031_p9 = pnand %p1030_p8, %p1024_p5 }
  0x17   :  { %1034 = shalt.err (!%p1031_p9)
}
  0x18   :  { %s1085_s7 = smov 128   ;;  %s1086_s8 = smov 8  }
  0x19   :  { %25 = dma.hbm_to_vmem [thread:$0]  %s1154_s0, 256, %s20_s29, [#allocation3], %s1085_s7, %s1085_s7, %s1086_s8  }
  0x1a   :  { %s1087_s11 = smov [#allocation7]  }
  0x1b   :  { %s47_s12 = sshll.u32 %s1087_s11, 4  ;;  %s48_s12 = int_to_ptr.vmem [resolvable:$true] %s47_s12 }
  0x1c   :  { %s1043_s2 = scalar_lea.vmem %s48_s12, 4096  ;;  %p1048_p11 = scmp.lt.s32.totalorder %s48_s12, %s48_s12 }
  0x1d   :  { %p1044_p10 = scmp.ne.s32.totalorder %s48_s12, %s1043_s2  ;;  %p1049_p12 = scmp.lt.s32.totalorder %s1043_s2, %s1043_s2 }
  0x1f   :  { %p1050_p13 = por %p1049_p12, %p1048_p11 }
  0x21   :  { %p1051_p0 = pnand %p1050_p13, %p1044_p10 }
  0x23   :  { %1054 = shalt.err (!%p1051_p0)
}
  0x24   :  { %s1088_s13 = smov 64   ;;  %s1089_s14 = smov 4  }
  0x25   :  { %53 = dma.hbm_to_vmem [thread:$0]  %s1158_s4, 4096, %s48_s12, [#allocation6], %s1088_s13, %s1088_s13, %s1089_s14  }
  0x26   :  { %1075 = dma.done.wait [#allocation3], 256  }
  0x27   :  { %1076 = vsyncadd [#allocation3], 4294967040 }
  0x28   :  { %1077 = dma.done.wait [#allocation6], 8192  }
  0x29   :  { %1078 = vsyncadd [#allocation6], 4294959104  ;;  %v1090_v0 = vmov 0   ;;  %v895_v1 = vld [vmem:[#allocation5 + $0xe4] ss:$16 sps:$4 sm:$0xff]   ;;  %v67_v28 = vld [vmem:[#allocation2 + $0x8] sm:$0xff] }
  0x2a   :  { %326 = vmatprep.mubr.bf16.mxu0 %v1090_v0  ;;  %369 = vmatprep.mubr.bf16.mxu1 %v1090_v0  ;;  %v897_v2 = vld [vmem:[#allocation5 + $0xec] ss:$16 sps:$4 sm:$0xff]   ;;  %v899_v3 = vld [vmem:[#allocation5 + $0xe0] ss:$16 sps:$4 sm:$0xff]   ;;  %v900_v4 = vld [vmem:[#allocation5 + $0xe8] ss:$16 sps:$4 sm:$0xff]  }
  0x2b   :  { %294 = vmatprep.subr.bf16.mxu0 %v895_v1  ;;  %337 = vmatprep.subr.bf16.mxu1 %v897_v2  ;;  %v901_v5 = vld [vmem:[#allocation5 + $0xc4] ss:$16 sps:$4 sm:$0xff]   ;;  %v903_v6 = vld [vmem:[#allocation5 + $0xcc] ss:$16 sps:$4 sm:$0xff]   ;;  %v905_v7 = vld [vmem:[#allocation5 + $0xc0] ss:$16 sps:$4 sm:$0xff]  }
  0x2c   :  { %295 = vmatpush1.bf16.msra.mxu0 %v899_v3  ;;  %338 = vmatpush1.bf16.msra.mxu1 %v900_v4  ;;  %v906_v8 = vld [vmem:[#allocation5 + $0xc8] ss:$16 sps:$4 sm:$0xff]   ;;  %v907_v9 = vld [vmem:[#allocation5 + $0xa4] ss:$16 sps:$4 sm:$0xff]   ;;  %v909_v10 = vld [vmem:[#allocation5 + $0xac] ss:$16 sps:$4 sm:$0xff]  }
  0x2d   :  { %296 = vmatprep.subr.bf16.mxu0 %v901_v5  ;;  %339 = vmatprep.subr.bf16.mxu1 %v903_v6  ;;  %v911_v11 = vld [vmem:[#allocation5 + $0xa0] ss:$16 sps:$4 sm:$0xff]   ;;  %v912_v12 = vld [vmem:[#allocation5 + $0xa8] ss:$16 sps:$4 sm:$0xff]   ;;  %v913_v13 = vld [vmem:[#allocation5 + $0x84] ss:$16 sps:$4 sm:$0xff]  }
  0x2e   :  { %v915_v14 = vld [vmem:[#allocation5 + $0x8c] ss:$16 sps:$4 sm:$0xff]   ;;  %v917_v15 = vld [vmem:[#allocation5 + $0x80] ss:$16 sps:$4 sm:$0xff]   ;;  %v918_v16 = vld [vmem:[#allocation5 + $0x88] ss:$16 sps:$4 sm:$0xff]  }
  0x2f   :  { %v919_v17 = vld [vmem:[#allocation5 + $0x64] ss:$16 sps:$4 sm:$0xff]   ;;  %v921_v18 = vld [vmem:[#allocation5 + $0x6c] ss:$16 sps:$4 sm:$0xff]   ;;  %v923_v19 = vld [vmem:[#allocation5 + $0x60] ss:$16 sps:$4 sm:$0xff]  }
  0x30   :  { %297 = vmatpush1.bf16.msra.mxu0 %v905_v7  ;;  %340 = vmatpush1.bf16.msra.mxu1 %v906_v8  ;;  %v924_v20 = vld [vmem:[#allocation5 + $0x68] ss:$16 sps:$4 sm:$0xff]   ;;  %v925_v21 = vld [vmem:[#allocation5 + $0x44] ss:$16 sps:$4 sm:$0xff]   ;;  %v927_v22 = vld [vmem:[#allocation5 + $0x4c] ss:$16 sps:$4 sm:$0xff]  }
  0x31   :  { %298 = vmatprep.subr.bf16.mxu0 %v907_v9  ;;  %341 = vmatprep.subr.bf16.mxu1 %v909_v10  ;;  %v929_v23 = vld [vmem:[#allocation5 + $0x40] ss:$16 sps:$4 sm:$0xff]   ;;  %v930_v24 = vld [vmem:[#allocation5 + $0x48] ss:$16 sps:$4 sm:$0xff]   ;;  %v931_v25 = vld [vmem:[#allocation5 + $0x24] ss:$16 sps:$4 sm:$0xff]   ;;  %v114_v9 = vlaneseq }
  0x32   :  { %v933_v26 = vld [vmem:[#allocation5 + $0x2c] ss:$16 sps:$4 sm:$0xff]   ;;  %v66_v27 = vld [vmem:[#allocation2] sm:$0xff]  ;;  %v936_v31 = vld [vmem:[#allocation5 + $0x28] ss:$16 sps:$4 sm:$0xff]   ;;  %s1091_s19 = smov [#allocation8]  }
  0x33   :  { %v935_v29 = vld [vmem:[#allocation5 + $0x20] ss:$16 sps:$4 sm:$0xff]   ;;  %v937_v34 = vld [vmem:[#allocation5 + $0x4] ss:$16 sps:$4 sm:$0xff]   ;;  %v939_v35 = vld [vmem:[#allocation5 + $0xc] ss:$16 sps:$4 sm:$0xff]  }
  0x34   :  { %299 = vmatpush1.bf16.msra.mxu0 %v911_v11  ;;  %342 = vmatpush1.bf16.msra.mxu1 %v912_v12  ;;  %v765_v30 = vld [vmem:[%s1155_s1] ss:$0 sm:$0xff]  ;;  %v942_v37 = vld [vmem:[#allocation5 + $0x8] ss:$16 sps:$4 sm:$0xff]   ;;  %v955_v53 = vld [vmem:[#allocation7 + $0x60] sm:$0xff]   ;;  %v115_v10 = vshrl.u32 %v114_v9, 7 }
  0x35   :  { %300 = vmatprep.subr.bf16.mxu0 %v913_v13  ;;  %343 = vmatprep.subr.bf16.mxu1 %v915_v14  ;;  %v75_v32 = vadd.f32 %v765_v30, %v66_v27  ;;  %v76_v33 = vadd.f32 %v765_v30, %v67_v28  ;;  %v941_v36 = vld [vmem:[#allocation5] ss:$16 sps:$4 sm:$0xff]   ;;  %v943_v38 = vld [vmem:[#allocation7 + $0x78] sm:$0xff]   ;;  %v951_v49 = vld [vmem:[#allocation7 + $0x68] sm:$0xff]   ;;  %s752_s20 = sshll.u32 %s1091_s19, 4  ;;  %s753_s20 = int_to_ptr.vmem [resolvable:$true] %s752_s20 }
  0x36   :  { %v944_v39 = vld [vmem:[#allocation7 + $0xf8] sm:$0xff]   ;;  %v947_v43 = vld [vmem:[#allocation7 + $0x70] sm:$0xff]   ;;  %v952_v50 = vld [vmem:[#allocation7 + $0xe8] sm:$0xff]   ;;  %v116_v11 = vsub.s32 0, %v115_v10  ;;  %v120_v13 = vsub.s32 1, %v115_v10  ;;  %v128_v14 = vsub.s32 3, %v115_v10  ;;  %p1060_p2 = scmp.lt.s32.totalorder %s753_s20, %s753_s20 }
  0x37   :  { %975 = vtanh.f32 %v75_v32  ;;  %v945_v40 = vld [vmem:[#allocation7 + $0x38] sm:$0xff]   ;;  %v948_v44 = vld [vmem:[#allocation7 + $0xf0] sm:$0xff]   ;;  %v953_v51 = vld [vmem:[#allocation7 + $0x28] sm:$0xff]   ;;  %s1055_s21 = scalar_lea.vmem %s753_s20, 128 }
  0x38   :  { %301 = vmatpush1.bf16.msra.mxu0 %v917_v15  ;;  %344 = vmatpush1.bf16.msra.mxu1 %v918_v16  ;;  %977 = vtanh.f32 %v76_v33  ;;  %v946_v41 = vld [vmem:[#allocation7 + $0xb8] sm:$0xff]   ;;  %v949_v47 = vld [vmem:[#allocation7 + $0x30] sm:$0xff]   ;;  %v954_v52 = vld [vmem:[#allocation7 + $0xa8] sm:$0xff]   ;;  %v124_v16 = vsub.s32 2, %v115_v10  ;;  %p1056_p1 = scmp.ne.s32.totalorder %s753_s20, %s1055_s21  ;;  %p1061_p3 = scmp.lt.s32.totalorder %s1055_s21, %s1055_s21 }
  0x39   :  { %302 = vmatprep.subr.bf16.mxu0 %v919_v17  ;;  %345 = vmatprep.subr.bf16.mxu1 %v921_v18  ;;  %v950_v48 = vld [vmem:[#allocation7 + $0xb0] sm:$0xff]   ;;  %v956_v54 = vld [vmem:[#allocation7 + $0xe0] sm:$0xff]   ;;  %v959_v57 = vld [vmem:[#allocation7 + $0x58] sm:$0xff]  }
  0x3a   :  { %v957_v55 = vld [vmem:[#allocation7 + $0x20] sm:$0xff]   ;;  %v960_v58 = vld [vmem:[#allocation7 + $0xd8] sm:$0xff]   ;;  %v963_v61 = vld [vmem:[#allocation7 + $0x50] sm:$0xff]   ;;  %p1062_p4 = por %p1061_p3, %p1060_p2 }
  0x3b   :  { %v958_v56 = vld [vmem:[#allocation7 + $0xa0] sm:$0xff]   ;;  %v961_v59 = vld [vmem:[#allocation7 + $0x18] sm:$0xff]   ;;  %v964_v62 = vld [vmem:[#allocation7 + $0xd0] sm:$0xff]  }
  0x3c   :  { %303 = vmatpush1.bf16.msra.mxu0 %v923_v19  ;;  %346 = vmatpush1.bf16.msra.mxu1 %v924_v20  ;;  %v962_v60 = vld [vmem:[#allocation7 + $0x98] sm:$0xff]   ;;  %v965_v63 = vld [vmem:[#allocation7 + $0x10] sm:$0xff]   ;;  %v967_v1 = vld [vmem:[#allocation7 + $0x48] sm:$0xff]   ;;  %p1063_p5 = pnand %p1062_p4, %p1056_p1 }
  0x3d   :  { %304 = vmatprep.subr.bf16.mxu0 %v925_v21  ;;  %347 = vmatprep.subr.bf16.mxu1 %v927_v22  ;;  %v966_v0 = vld [vmem:[#allocation7 + $0x90] sm:$0xff]   ;;  %v968_v2 = vld [vmem:[#allocation7 + $0xc8] sm:$0xff]   ;;  %v971_v5 = vld [vmem:[#allocation7 + $0x40] sm:$0xff]  }
  0x3e   :  { %v969_v3 = vld [vmem:[#allocation7 + $0x8] sm:$0xff]   ;;  %v972_v6 = vld [vmem:[#allocation7 + $0xc0] sm:$0xff]   ;;  %v112_v12 = vld [vmem:[%s1157_s3] sm:$0xf] }
  0x3f   :  { %v970_v4 = vld [vmem:[#allocation7 + $0x88] sm:$0xff]   ;;  %v973_v7 = vld [vmem:[#allocation7] sm:$0xff]   ;;  %v117_v15 = vrot.slane %v112_v12, %v116_v11  ;;  %v121_v17 = vrot.slane %v112_v12, %v120_v13  ;;  %v129_v18 = vrot.slane %v112_v12, %v128_v14 }
  0x40   :  { %305 = vmatpush1.bf16.msra.mxu0 %v929_v23  ;;  %348 = vmatpush1.bf16.msra.mxu1 %v930_v24  ;;  %v974_v8 = vld [vmem:[#allocation7 + $0x80] sm:$0xff]   ;;  %v125_v24 = vrot.slane %v112_v12, %v124_v16 }
  0x41   :  { %306 = vmatprep.subr.bf16.mxu0 %v931_v25  ;;  %349 = vmatprep.subr.bf16.mxu1 %v933_v26 }
  0x44   :  { %307 = vmatpush1.bf16.msra.mxu0 %v935_v29  ;;  %350 = vmatpush1.bf16.msra.mxu1 %v936_v31  ;;  %v976_v42 = vpop.eup %975 }
  0x45   :  { %308 = vmatprep.subr.bf16.mxu0 %v937_v34  ;;  %351 = vmatprep.subr.bf16.mxu1 %v939_v35  ;;  %v978_v45 = vpop.eup %977 }
  0x46   :  { %v79_v46 = vpack.c.bf16 %v978_v45, %v976_v42 }
  0x48   :  { %309 = vmatpush1.bf16.msra.mxu0 %v941_v36  ;;  %352 = vmatpush1.bf16.msra.mxu1 %v942_v37 }
  0x49   :  { %840 = vmatprep.subr.bf16.mxu0 %v943_v38  ;;  %862 = vmatprep.subr.bf16.mxu1 %v944_v39 }
  0x4b   :  { %327 = vmatmul.mubr.bf16.vlgmr.msra.gmra.mxu0 %v79_v46  ;;  %370 = vmatmul.mubr.bf16.vlgmr.msra.gmra.mxu1 %v79_v46 }
  0x4c   :  { %841 = vmatpush3.bf16.msra.mxu0 %v945_v40  ;;  %863 = vmatpush3.bf16.msra.mxu1 %v946_v41 }
  0x4d   :  { %842 = vmatprep.subr.bf16.mxu0 %v947_v43  ;;  %864 = vmatprep.subr.bf16.mxu1 %v948_v44 }
  0x50   :  { %843 = vmatpush3.bf16.msra.mxu0 %v949_v47  ;;  %865 = vmatpush3.bf16.msra.mxu1 %v950_v48 }
  0x51   :  { %844 = vmatprep.subr.bf16.mxu0 %v951_v49  ;;  %866 = vmatprep.subr.bf16.mxu1 %v952_v50 }
  0x54   :  { %845 = vmatpush3.bf16.msra.mxu0 %v953_v51  ;;  %867 = vmatpush3.bf16.msra.mxu1 %v954_v52 }
  0x55   :  { %846 = vmatprep.subr.bf16.mxu0 %v955_v53  ;;  %868 = vmatprep.subr.bf16.mxu1 %v956_v54  ;;  %v798_v53 = vld [vmem:[%s1159_s5] ss:$0 sm:$0xff] }
  0x58   :  { %847 = vmatpush3.bf16.msra.mxu0 %v957_v55  ;;  %869 = vmatpush3.bf16.msra.mxu1 %v958_v56 }
  0x59   :  { %848 = vmatprep.subr.bf16.mxu0 %v959_v57  ;;  %870 = vmatprep.subr.bf16.mxu1 %v960_v58 }
  0x5c   :  { %849 = vmatpush3.bf16.msra.mxu0 %v961_v59  ;;  %871 = vmatpush3.bf16.msra.mxu1 %v962_v60 }
  0x5d   :  { %850 = vmatprep.subr.bf16.mxu0 %v963_v61  ;;  %872 = vmatprep.subr.bf16.mxu1 %v964_v62 }
  0x60   :  { %851 = vmatpush3.bf16.msra.mxu0 %v965_v63  ;;  %873 = vmatpush3.bf16.msra.mxu1 %v966_v0 }
  0x61   :  { %852 = vmatprep.subr.bf16.mxu0 %v967_v1  ;;  %874 = vmatprep.subr.bf16.mxu1 %v968_v2 }
  0x64   :  { %853 = vmatpush3.bf16.msra.mxu0 %v969_v3  ;;  %875 = vmatpush3.bf16.msra.mxu1 %v970_v4 }
  0x65   :  { %854 = vmatprep.subr.bf16.mxu0 %v971_v5  ;;  %876 = vmatprep.subr.bf16.mxu1 %v972_v6 }
  0x68   :  { %855 = vmatpush3.bf16.msra.mxu0 %v973_v7  ;;  %877 = vmatpush3.bf16.msra.mxu1 %v974_v8 }
 0x10b   :  { %v328_v19 = vpop.f32.mrf.mxu0  ;;  %v371_v20 = vpop.f32.mrf.mxu1 }
 0x10c   :  { %v329_v21 = vadd.f32 %v328_v19, %v117_v15  ;;  %v372_v33 = vadd.f32 %v371_v20, %v125_v24 }
 0x10d   :  { %v330_v22 = vpop.f32.mrf.mxu0  ;;  %v373_v23 = vpop.f32.mrf.mxu1 }
 0x10e   :  { %v331_v25 = vadd.f32 %v330_v22, %v121_v17  ;;  %v374_v26 = vadd.f32 %v373_v23, %v129_v18  ;;  %979 = vtanh.f32 %v329_v21 }
 0x10f   :  { %v332_v27 = vpop.f32.mrf.mxu0  ;;  %v375_v28 = vpop.f32.mrf.mxu1 }
 0x110   :  { %981 = vtanh.f32 %v331_v25  ;;  %v333_v29 = vadd.f32 %v332_v27, %v117_v15  ;;  %v376_v30 = vadd.f32 %v375_v28, %v125_v24 }
 0x111   :  { %983 = vtanh.f32 %v374_v26  ;;  %v334_v31 = vpop.f32.mrf.mxu0  ;;  %v377_v32 = vpop.f32.mrf.mxu1 }
 0x112   :  { %985 = vtanh.f32 %v333_v29  ;;  %v335_v34 = vadd.f32 %v334_v31, %v121_v17  ;;  %v378_v35 = vadd.f32 %v377_v32, %v129_v18 }
 0x113   :  { %987 = vtanh.f32 %v376_v30 }
 0x114   :  { %989 = vtanh.f32 %v335_v34 }
 0x115   :  { %991 = vtanh.f32 %v378_v35 }
 0x116   :  { %993 = vtanh.f32 %v372_v33 }
 0x11b   :  { %v980_v36 = vpop.eup %979 }
 0x11d   :  { %v982_v37 = vpop.eup %981 }
 0x11e   :  { %v984_v38 = vpop.eup %983 }
 0x11f   :  { %v986_v39 = vpop.eup %985 }
 0x120   :  { %v988_v40 = vpop.eup %987  ;;  %v388_v46 = vpack.c.bf16 %v986_v39, %v980_v36 }
 0x121   :  { %v990_v41 = vpop.eup %989 }
 0x122   :  { %v992_v42 = vpop.eup %991  ;;  %v389_v43 = vpack.c.bf16 %v990_v41, %v982_v37 }
 0x123   :  { %v994_v44 = vpop.eup %993  ;;  %v391_v45 = vpack.c.bf16 %v992_v42, %v984_v38 }
 0x124   :  { %687 = vmatprep.mubr.bf16.mxu0 %v389_v43  ;;  %v390_v47 = vpack.c.bf16 %v988_v40, %v994_v44 }
 0x125   :  { %728 = vmatprep.mubr.bf16.mxu1 %v391_v45  ;;  %688 = vmatmul.mubr.bf16.vlgmr.msra.gmra.mxu0 %v388_v46 }
 0x126   :  { %729 = vmatmul.mubr.bf16.vlgmr.msra.gmra.mxu1 %v390_v47 }
 0x1e5   :  { %v856_v48 = vpop.f32.mrf.mxu0 }
 0x1e6   :  { %v878_v49 = vpop.f32.mrf.mxu1 }
 0x1e7   :  { %v857_v50 = vpop.f32.mrf.mxu0 }
 0x1e8   :  { %v858_v51 = vadd.f32 %v857_v50, %v856_v48  ;;  %v879_v52 = vpop.f32.mrf.mxu1 }
 0x1e9   :  { %v859_v54 = vpop.f32.mrf.mxu0  ;;  %v880_v60 = vadd.f32 %v879_v52, %v878_v49 }
 0x1ea   :  { %v881_v55 = vpop.f32.mrf.mxu1  ;;  %v690_v57 = vadd.f32 %v858_v51, %v798_v53 }
 0x1eb   :  { %v860_v56 = vpop.f32.mrf.mxu0 }
 0x1ec   :  { %v861_v58 = vadd.f32 %v860_v56, %v859_v54  ;;  %v882_v59 = vpop.f32.mrf.mxu1  ;;  %v731_v63 = vadd.f32 %v880_v60, %v690_v57 }
 0x1ed   :  { %v883_v62 = vadd.f32 %v882_v59, %v881_v55 }
 0x1ee   :  { %v693_v61 = vadd.f32 %v861_v58, %v798_v53 }
 0x1f0   :  { %v734_v0 = vadd.f32 %v883_v62, %v693_v61 }
 0x1f2   :  { %v838_v1 = vpack.c.bf16 %v734_v0, %v731_v63 }
 0x1f4   :  { %839 = vst [vmem:[#allocation8] sm:$0xff] %v838_v1  }
 0x1f5   :  { %1066 = shalt.err (!%p1063_p5)
}
 0x1f6   :  { %758 = dma.vmem_to_hbm [thread:$0]  %s753_s20, 128, %s1160_s6, [#allocation4], %s1088_s13, %s1088_s13, %s1089_s14  }
 0x1f7   :  { %1079 = dma.done.wait [#allocation4], 128  }
 0x1f8   :  { %1080 = vsyncadd [#allocation4], 4294967168 }
 0x1f9   :  { %762 = vsyncpa [#allocation3], 1 }
 0x1fa   :  { %763 = vsyncpa [#allocation6], 1 }
 0x1fb   :  { %764 = vsyncpa [#allocation4], 1 }

</bundles_post_ra>
